<compile_context>
chip_gen: v5e
topology: v5e:2x2
jax: 0.10.0
libtpu: 0.0.40
codegen_flags: <defaults>
</compile_context>

<pallas_src>
import jax
import jax.numpy as jnp
from jax.experimental import pallas as pl
from jax.experimental.pallas import tpu as pltpu


HIDDEN = 512
HEAD_PAD = 128   # lane-dense width of the stacked-head matmul (MXU friendly)
OUT_PAD = 8      # narrow output writeback; only cols 0 (d_start) / 1 (d_goal) are real
BN_EPS = 1e-5


def _round_up(n, m):
    return (n + m - 1) // m * m


def _geo_kernel(x_ref, w1_ref, shift_ref, wh_ref, bh_ref, out_ref):
    """Single-shot forward for one batch tile.

    x_ref:     (Bt, K)        f32 input tile (streamed / double-buffered)
    w1_ref:    (K, 512)       bf16 shared weight with BN scale pre-folded (resident)
    shift_ref: (1, 512)       f32 folded BN shift (resident)
    wh_ref:    (512, 128)     bf16 stacked + zero-padded head weights (resident)
    bh_ref:    (1, 8)         f32 stacked + zero-padded head biases (resident)
    out_ref:   (Bt, 8)        f32 narrow output; col 0 = d_start, col 1 = d_goal
    """
    # Cast the streamed f32 tile to bf16 on the VPU (huge slack here) so HBM
    # only carries 4 B/elem for x instead of a separate cast pass.
    x = x_ref[...].astype(jnp.bfloat16)

    # Shared Linear (bias=False) with BN scale folded into the weight.
    acc = jnp.dot(x, w1_ref[...], preferred_element_type=jnp.float32)

    # Fused BatchNorm (eval) shift + ReLU in f32.
    h = jnp.maximum(acc + shift_ref[...], 0.0)

    # Both heads as one lane-dense (512, 128) MXU matmul; only the first
    # OUT_PAD columns are stored (narrow writeback).
    heads = jnp.dot(h.astype(jnp.bfloat16), wh_ref[...],
                    preferred_element_type=jnp.float32)
    out_ref[...] = heads[:, :OUT_PAD] + bh_ref[...]


def geo_model_forward(x, params, *, btile=512):
    """Pallas implementation of GeoModel.forward (eval-mode BatchNorm).

    x: (B, input_size) float32 (bf16 also accepted)
    returns: (d_start, d_goal), each of shape (B,)
    """
    B, K = x.shape

    # Fold BatchNorm1d (eval mode): scale goes into w1, shift stays separate.
    scale = params["gamma"] / jnp.sqrt(params["running_var"] + BN_EPS)
    shift = (params["beta"] - params["running_mean"] * scale)
    shift = shift.reshape(1, HIDDEN).astype(jnp.float32)
    w1_folded = (params["w1"] * scale[None, :]).astype(jnp.bfloat16)      # (K, 512)

    # Stack the two (512 -> 1) heads into one lane-dense (512, 128) matmul.
    wh = jnp.zeros((HIDDEN, HEAD_PAD), jnp.float32)
    wh = wh.at[:, 0].set(params["w_start"][:, 0])
    wh = wh.at[:, 1].set(params["w_goal"][:, 0])
    wh = wh.astype(jnp.bfloat16)                                          # (512, 128)
    bh = jnp.zeros((1, OUT_PAD), jnp.float32)
    bh = bh.at[0, 0].set(params["b_start"])
    bh = bh.at[0, 1].set(params["b_goal"])                                # (1, 8)

    # Batch tile: multiple of 8 sublanes, no padding of x -- the last grid
    # step may be ragged and Pallas masks its out-of-bounds output rows.
    bt = min(btile, _round_up(B, 8))
    bt = max(8, _round_up(bt, 8))
    grid = (pl.cdiv(B, bt),)

    # VMEM budget: double-buffered f32 x tile + double-buffered residents +
    # narrow out tile, with headroom.  Capped at 48 MiB so it is safe on
    # v7x's 64 MiB physical VMEM while raising v5e/v6e scoped defaults.
    need = (2 * bt * K * 4                      # x tile (f32, 2 buffers)
            + 2 * K * HIDDEN * 2                # w1 (bf16, 2 buffers)
            + 2 * HIDDEN * HEAD_PAD * 2         # head weights (bf16)
            + 2 * bt * OUT_PAD * 4              # out tile (f32)
            + 2 * (HIDDEN + OUT_PAD) * 4)       # shift + biases
    vmem_limit = int(min(max(need * 5 // 4 + (4 << 20), 32 << 20), 48 << 20))

    out = pl.pallas_call(
        _geo_kernel,
        out_shape=jax.ShapeDtypeStruct((B, OUT_PAD), jnp.float32),
        grid_spec=pltpu.PrefetchScalarGridSpec(
            num_scalar_prefetch=0,
            grid=grid,
            in_specs=[
                pl.BlockSpec((bt, K), lambda b: (b, 0)),              # x batch tile
                pl.BlockSpec((K, HIDDEN), lambda b: (0, 0)),          # w1 (resident)
                pl.BlockSpec((1, HIDDEN), lambda b: (0, 0)),          # BN shift
                pl.BlockSpec((HIDDEN, HEAD_PAD), lambda b: (0, 0)),   # head weights
                pl.BlockSpec((1, OUT_PAD), lambda b: (0, 0)),         # head biases
            ],
            out_specs=pl.BlockSpec((bt, OUT_PAD), lambda b: (b, 0)),
        ),
        compiler_params=pltpu.CompilerParams(
            dimension_semantics=("parallel",),
            vmem_limit_bytes=vmem_limit,
        ),
    )(x, w1_folded, shift, wh, bh)

    d_start = out[:, 0]   # squeeze(-1)
    d_goal = out[:, 1]    # squeeze(-1)
    return d_start, d_goal


def _reference_forward_bf16(x, params):
    """Pure-JAX reference matching the kernel's bf16-matmul / f32-accumulate math."""
    scale = params["gamma"] / jnp.sqrt(params["running_var"] + BN_EPS)
    shift = params["beta"] - params["running_mean"] * scale
    w1f = (params["w1"] * scale[None, :]).astype(jnp.bfloat16).astype(jnp.float32)
    xb = x.astype(jnp.bfloat16).astype(jnp.float32)
    h = jnp.maximum(xb @ w1f + shift, 0.0)
    hb = h.astype(jnp.bfloat16).astype(jnp.float32)
    ws = params["w_start"][:, 0].astype(jnp.bfloat16).astype(jnp.float32)
    wg = params["w_goal"][:, 0].astype(jnp.bfloat16).astype(jnp.float32)
    return hb @ ws + params["b_start"], hb @ wg + params["b_goal"]


def _reference_forward_f32(x, params):
    """Full-precision semantic reference (eval-mode BN)."""
    scale = params["gamma"] / jnp.sqrt(params["running_var"] + BN_EPS)
    shift = params["beta"] - params["running_mean"] * scale
    h = jnp.maximum(x @ params["w1"] * scale + shift, 0.0)
    d_start = h @ params["w_start"][:, 0] + params["b_start"]
    d_goal = h @ params["w_goal"][:, 0] + params["b_goal"]
    return d_start, d_goal


def make_params(key, input_size):
    ks = jax.random.split(key, 8)
    return {
        # nn.Linear(input_size, 512, bias=False): weight stored transposed as
        # (input_size, 512) for x @ W.
        "w1": jax.random.normal(ks[0], (input_size, HIDDEN), jnp.float32) * 0.05,
        # nn.BatchNorm1d(512) parameters and running stats.
        "gamma": 1.0 + 0.1 * jax.random.normal(ks[1], (HIDDEN,), jnp.float32),
        "beta": 0.1 * jax.random.normal(ks[2], (HIDDEN,), jnp.float32),
        "running_mean": 0.1 * jax.random.normal(ks[3], (HIDDEN,), jnp.float32),
        "running_var": jnp.abs(1.0 + 0.1 * jax.random.normal(ks[4], (HIDDEN,), jnp.float32)),
        # nn.Linear(512, 1) heads, stored as (512, 1).
        "w_start": jax.random.normal(ks[5], (HIDDEN, 1), jnp.float32) * 0.05,
        "b_start": jnp.float32(0.01),
        "w_goal": jax.random.normal(ks[6], (HIDDEN, 1), jnp.float32) * 0.05,
        "b_goal": jnp.float32(-0.02),
    }


if __name__ == "__main__":
    key = jax.random.PRNGKey(0)
    k_params, k_x = jax.random.split(key)

    B, INPUT_SIZE = 8, 256
    params = make_params(k_params, INPUT_SIZE)
    x = jax.random.normal(k_x, (B, INPUT_SIZE), jnp.float32)

    d_start, d_goal = geo_model_forward(x, params)
    jax.block_until_ready((d_start, d_goal))

    assert d_start.shape == (B,) and d_goal.shape == (B,)

    # Tight check against a reference with matching bf16-matmul numerics.
    ref_s, ref_g = _reference_forward_bf16(x, params)
    assert jnp.allclose(d_start, ref_s, atol=2e-3, rtol=2e-3)
    assert jnp.allclose(d_goal, ref_g, atol=2e-3, rtol=2e-3)

    # Loose semantic check against the full-f32 reference.
    f32_s, f32_g = _reference_forward_f32(x, params)
    assert jnp.allclose(d_start, f32_s, atol=5e-2, rtol=5e-2)
    assert jnp.allclose(d_goal, f32_g, atol=5e-2, rtol=5e-2)

    print("KERNEL_OK")
</pallas_src>

<mosaic_0001>
module attributes {stable_mosaic.version = 11 : i64} {
  func.func @_geo_kernel(%arg0: i32, %arg1: memref<8x256xf32, #tpu.memory_space<vmem>>, %arg2: memref<256x512xbf16, #tpu.memory_space<vmem>>, %arg3: memref<1x512xf32, #tpu.memory_space<vmem>>, %arg4: memref<512x128xbf16, #tpu.memory_space<vmem>>, %arg5: memref<1x8xf32, #tpu.memory_space<vmem>>, %arg6: memref<8x8xf32, #tpu.memory_space<vmem>>) attributes {dimension_semantics = [#tpu.dimension_semantics<parallel>], iteration_bounds = array<i64: 1>, scalar_prefetch = 0 : i64, scratch_operands = 0 : i64, tpu.core_type = #tpu.core_type<tc>, window_params = [{transform_indices = @transform_0, window_bounds = array<i64: 8, 256>}, {pipeline_mode = #tpu.pipeline_mode<synchronous>, transform_indices = @transform_1, window_bounds = array<i64: 256, 512>}, {pipeline_mode = #tpu.pipeline_mode<synchronous>, transform_indices = @transform_2, window_bounds = array<i64: 1, 512>}, {pipeline_mode = #tpu.pipeline_mode<synchronous>, transform_indices = @transform_3, window_bounds = array<i64: 512, 128>}, {pipeline_mode = #tpu.pipeline_mode<synchronous>, transform_indices = @transform_4, window_bounds = array<i64: 1, 8>}, {transform_indices = @transform_5, window_bounds = array<i64: 8, 8>}]} {
    %c0 = arith.constant 0 : index
    %c0_0 = arith.constant 0 : index
    %0 = vector.load %arg1[%c0, %c0_0] : memref<8x256xf32, #tpu.memory_space<vmem>>, vector<8x256xf32>
    %1 = arith.truncf %0 : vector<8x256xf32> to vector<8x256xbf16>
    %c0_1 = arith.constant 0 : index
    %c0_2 = arith.constant 0 : index
    %2 = vector.load %arg2[%c0_1, %c0_2] : memref<256x512xbf16, #tpu.memory_space<vmem>>, vector<256x512xbf16>
    %cst = arith.constant dense<0.000000e+00> : vector<8x512xf32>
    %3 = tpu.matmul %1, %2, %cst {dimension_numbers = #tpu.dot_dimension_numbers<[1], [0], [0], [1], [0, 0, 1, 1], [], []>} : vector<8x256xbf16>, vector<256x512xbf16>, vector<8x512xf32> -> vector<8x512xf32>
    %c0_3 = arith.constant 0 : index
    %c0_4 = arith.constant 0 : index
    %4 = vector.load %arg3[%c0_3, %c0_4] : memref<1x512xf32, #tpu.memory_space<vmem>>, vector<1x512xf32>
    %5 = vector.broadcast %4 : vector<1x512xf32> to vector<8x512xf32>
    %6 = arith.addf %3, %5 : vector<8x512xf32>
    %cst_5 = arith.constant 0.000000e+00 : f32
    %7 = vector.broadcast %cst_5 : f32 to vector<8x512xf32>
    %8 = arith.maximumf %6, %7 : vector<8x512xf32>
    %9 = arith.truncf %8 : vector<8x512xf32> to vector<8x512xbf16>
    %c0_6 = arith.constant 0 : index
    %c0_7 = arith.constant 0 : index
    %10 = vector.load %arg4[%c0_6, %c0_7] : memref<512x128xbf16, #tpu.memory_space<vmem>>, vector<512x128xbf16>
    %cst_8 = arith.constant dense<0.000000e+00> : vector<8x128xf32>
    %11 = tpu.matmul %9, %10, %cst_8 {dimension_numbers = #tpu.dot_dimension_numbers<[1], [0], [0], [1], [0, 0, 1, 1], [], []>} : vector<8x512xbf16>, vector<512x128xbf16>, vector<8x128xf32> -> vector<8x128xf32>
    %12 = vector.extract_strided_slice %11 {offsets = [0, 0], sizes = [8, 8], strides = [1, 1]} : vector<8x128xf32> to vector<8x8xf32>
    %c0_9 = arith.constant 0 : index
    %c0_10 = arith.constant 0 : index
    %13 = vector.load %arg5[%c0_9, %c0_10] : memref<1x8xf32, #tpu.memory_space<vmem>>, vector<1x8xf32>
    %14 = vector.broadcast %13 : vector<1x8xf32> to vector<8x8xf32>
    %15 = arith.addf %12, %14 : vector<8x8xf32>
    %c0_11 = arith.constant 0 : index
    %c0_12 = arith.constant 0 : index
    %16 = vector.load %arg6[%c0_11, %c0_12] : memref<8x8xf32, #tpu.memory_space<vmem>>, vector<8x8xf32>
    tpu.vector_store %arg6[%c0_11, %c0_12], %15 {strides = array<i32>} : memref<8x8xf32, #tpu.memory_space<vmem>>, vector<8x8xf32>,
    return
  }
  func.func @transform_0(%arg0: i32) -> (i32, i32) {
    %c0_i32 = arith.constant 0 : i32
    %c0_i32_0 = arith.constant 0 : i32
    return %arg0, %c0_i32 : i32, i32
  }
  func.func @transform_1(%arg0: i32) -> (i32, i32) {
    %c0_i32 = arith.constant 0 : i32
    %c0_i32_0 = arith.constant 0 : i32
    %c0_i32_1 = arith.constant 0 : i32
    return %c0_i32, %c0_i32_0 : i32, i32
  }
  func.func @transform_2(%arg0: i32) -> (i32, i32) {
    %c0_i32 = arith.constant 0 : i32
    %c0_i32_0 = arith.constant 0 : i32
    %c0_i32_1 = arith.constant 0 : i32
    return %c0_i32, %c0_i32_0 : i32, i32
  }
  func.func @transform_3(%arg0: i32) -> (i32, i32) {
    %c0_i32 = arith.constant 0 : i32
    %c0_i32_0 = arith.constant 0 : i32
    %c0_i32_1 = arith.constant 0 : i32
    return %c0_i32, %c0_i32_0 : i32, i32
  }
  func.func @transform_4(%arg0: i32) -> (i32, i32) {
    %c0_i32 = arith.constant 0 : i32
    %c0_i32_0 = arith.constant 0 : i32
    %c0_i32_1 = arith.constant 0 : i32
    return %c0_i32, %c0_i32_0 : i32, i32
  }
  func.func @transform_5(%arg0: i32) -> (i32, i32) {
    %c0_i32 = arith.constant 0 : i32
    %c0_i32_0 = arith.constant 0 : i32
    return %arg0, %c0_i32 : i32, i32
  }
}

</mosaic_0001>

<bundles_post_ra>
// kernel: tpu_custom_call.1
= control target key start
LH: loop header
LB: loop body
LE: loop exit
PB: predicated region body
PF: predicated region fallthrough
CT: control target
= control target key end

     0   :  { %10 = vsyncpa [#allocation3], 0  ;;  %s1611_s0 = inlined_call_operand.hbm [shape: f32[8,256], index: 0, kind: input, shape index: {}]   ;;  %s1612_s1 = inlined_call_operand.hbm [shape: bf16[256,512], index: 1, kind: input, shape index: {}]   ;;  %s1613_s2 = inlined_call_operand.hbm [shape: f32[1,512], index: 2, kind: input, shape index: {}]   ;;  %s1614_s3 = inlined_call_operand.hbm [shape: bf16[512,128], index: 3, kind: input, shape index: {}]   ;;  %s1615_s4 = inlined_call_operand.vmem [shape: f32[1,8], index: 4, kind: input, shape index: {}]   ;;  %s1616_s5 = inlined_call_operand.hbm [shape: f32[8,8], index: 5, kind: output, shape index: {}]  }
   0x1   :  { %11 = vsyncpa [#allocation6], 0 }
   0x2   :  { %12 = vsyncpa [#allocation9], 0  ;;  %s29_s20 = sshll.u32 %s1612_s1, 4  ;;  %s30_s20 = int_to_ptr.hbm [resolvable:$true] %s29_s20 }
   0x3   :  { %13 = vsyncpa [#allocation4], 0  ;;  %s1542_s21 = smov [#allocation5]   ;;  %s19_s25 = sshll.u32 %s1611_s0, 4  ;;  %s20_s25 = int_to_ptr.hbm [resolvable:$true] %s19_s25 }
   0x4   :  { %s31_s22 = sshll.u32 %s1542_s21, 4  ;;  %s1543_s26 = smov 256   ;;  %s32_s22 = int_to_ptr.vmem [resolvable:$true] %s31_s22 }
   0x5   :  { %s1544_s27 = smov 16   ;;  %s1545_s28 = smov [#allocation2]  }
   0x6   :  { %37 = dma.hbm_to_vmem [thread:$0]  %s30_s20, 8192, %s32_s22, [#allocation6], %s1543_s26, %s1543_s26, %s1544_s27  }
   0x7   :  { %s21_s29 = sshll.u32 %s1545_s28, 4  ;;  %s43_s7 = sshll.u32 %s1613_s2, 4  ;;  %s22_s29 = int_to_ptr.vmem [resolvable:$true] %s21_s29  ;;  %s44_s7 = int_to_ptr.hbm [resolvable:$true] %s43_s7 }
   0x8   :  { %24 = dma.hbm_to_vmem [thread:$0]  %s20_s25, 256, %s22_s29, [#allocation3]  }
   0x9   :  { %s53_s9 = sshll.u32 %s1614_s3, 4  ;;  %s1546_s10 = smov [#allocation7]   ;;  %s54_s9 = int_to_ptr.hbm [resolvable:$true] %s53_s9 }
   0xa   :  { %s45_s11 = sshll.u32 %s1546_s10, 4  ;;  %s1547_s0 = smov [#allocation8]   ;;  %s46_s11 = int_to_ptr.vmem [resolvable:$true] %s45_s11 }
   0xb   :  { %48 = dma.hbm_to_vmem [thread:$0]  %s44_s7, 64, %s46_s11, [#allocation6]  }
   0xc   :  { %s55_s12 = sshll.u32 %s1547_s0, 4  ;;  %s1548_s13 = smov 64   ;;  %s56_s12 = int_to_ptr.vmem [resolvable:$true] %s55_s12 }
   0xd   :  { %s1549_s14 = smov 4  }
   0xe   :  { %61 = dma.hbm_to_vmem [thread:$0]  %s54_s9, 4096, %s56_s12, [#allocation9], %s1548_s13, %s1548_s13, %s1549_s14  }
   0xf   :  { %1534 = dma.done.wait [#allocation3], 256  }
  0x10   :  { %1535 = vsyncadd [#allocation3], 4294967040 }
  0x11   :  { %1536 = dma.done.wait [#allocation6], 8256  }
  0x12   :  { %1537 = vsyncadd [#allocation6], 4294959040 }
  0x13   :  { %1538 = dma.done.wait [#allocation9], 4096  }
  0x14   :  { %1539 = vsyncadd [#allocation9], 4294963200  ;;  %v1038_v0 = vld [vmem:[#allocation5 + $0xe0] sm:$0xf]  ;;  %v1338_v1 = vld [vmem:[#allocation5 + $0xec] sm:$0xf0] }
  0x15   :  { %v1166_v2 = vld [vmem:[#allocation5 + $0x1e0] sm:$0xf]  ;;  %v1039_v3 = vor.u32 %v1338_v1, %v1038_v0  ;;  %v1370_v4 = vld [vmem:[#allocation5 + $0x1ec] sm:$0xf0]  ;;  %v1336_v5 = vld [vmem:[#allocation5 + $0xe4] sm:$0xf] }
  0x16   :  { %v1040_v6 = vld [vmem:[#allocation5 + $0xf0] sm:$0xf0]  ;;  %v1167_v7 = vor.u32 %v1370_v4, %v1166_v2  ;;  %v1368_v9 = vld [vmem:[#allocation5 + $0x1e4] sm:$0xf]  ;;  %v1022_v11 = vld [vmem:[#allocation5 + $0xc0] sm:$0xf] }
  0x17   :  { %v1043_v8 = vor.u32 %v1336_v5, %v1040_v6  ;;  %v1168_v10 = vld [vmem:[#allocation5 + $0x1f0] sm:$0xf0]  ;;  %478 = vmatpush.bf16.msra.mxu0 %v1039_v3  ;;  %v1334_v13 = vld [vmem:[#allocation5 + $0xcc] sm:$0xf0]  ;;  %v1150_v14 = vld [vmem:[#allocation5 + $0x1c0] sm:$0xf] }
  0x18   :  { %v1171_v12 = vor.u32 %v1368_v9, %v1168_v10  ;;  %v1366_v15 = vld [vmem:[#allocation5 + $0x1cc] sm:$0xf0]  ;;  %491 = vmatpush.bf16.msra.mxu1 %v1167_v7  ;;  %v1023_v16 = vor.u32 %v1334_v13, %v1022_v11  ;;  %v1332_v18 = vld [vmem:[#allocation5 + $0xc4] sm:$0xf]  ;;  %v1024_v19 = vld [vmem:[#allocation5 + $0xd0] sm:$0xf0] }
  0x19   :  { %504 = vmatpush.bf16.msra.mxu2 %v1043_v8  ;;  %v1151_v17 = vor.u32 %v1366_v15, %v1150_v14  ;;  %v1364_v20 = vld [vmem:[#allocation5 + $0x1c4] sm:$0xf]  ;;  %v1027_v21 = vor.u32 %v1332_v18, %v1024_v19  ;;  %v1152_v22 = vld [vmem:[#allocation5 + $0x1d0] sm:$0xf0]  ;;  %v1006_v23 = vld [vmem:[#allocation5 + $0xa0] sm:$0xf] }
  0x1a   :  { %517 = vmatpush.bf16.msra.mxu3 %v1171_v12  ;;  %v1330_v24 = vld [vmem:[#allocation5 + $0xac] sm:$0xf0]  ;;  %v1155_v25 = vor.u32 %v1364_v20, %v1152_v22  ;;  %v1134_v26 = vld [vmem:[#allocation5 + $0x1a0] sm:$0xf]  ;;  %v1328_v28 = vld [vmem:[#allocation5 + $0xa4] sm:$0xf] }
  0x1b   :  { %v1362_v27 = vld [vmem:[#allocation5 + $0x1ac] sm:$0xf0]  ;;  %479 = vmatpush.bf16.msra.mxu0 %v1023_v16  ;;  %v1007_v29 = vor.u32 %v1330_v24, %v1006_v23  ;;  %v1008_v30 = vld [vmem:[#allocation5 + $0xb0] sm:$0xf0]  ;;  %v1360_v31 = vld [vmem:[#allocation5 + $0x1a4] sm:$0xf] }
  0x1c   :  { %v1136_v32 = vld [vmem:[#allocation5 + $0x1b0] sm:$0xf0]  ;;  %492 = vmatpush.bf16.msra.mxu1 %v1151_v17  ;;  %v1135_v33 = vor.u32 %v1362_v27, %v1134_v26  ;;  %v1011_v34 = vor.u32 %v1328_v28, %v1008_v30  ;;  %v990_v35 = vld [vmem:[#allocation5 + $0x80] sm:$0xf]  ;;  %v1326_v36 = vld [vmem:[#allocation5 + $0x8c] sm:$0xf0] }
  0x1d   :  { %505 = vmatpush.bf16.msra.mxu2 %v1027_v21  ;;  %v1118_v37 = vld [vmem:[#allocation5 + $0x180] sm:$0xf]  ;;  %v1139_v38 = vor.u32 %v1360_v31, %v1136_v32  ;;  %v1358_v39 = vld [vmem:[#allocation5 + $0x18c] sm:$0xf0]  ;;  %v1324_v40 = vld [vmem:[#allocation5 + $0x84] sm:$0xf]  ;;  %v991_v44 = vor.u32 %v1326_v36, %v990_v35 }
  0x1e   :  { %518 = vmatpush.bf16.msra.mxu3 %v1155_v25  ;;  %v992_v41 = vld [vmem:[#allocation5 + $0x90] sm:$0xf0]  ;;  %v1356_v42 = vld [vmem:[#allocation5 + $0x184] sm:$0xf]  ;;  %v1119_v45 = vor.u32 %v1358_v39, %v1118_v37  ;;  %v974_v47 = vld [vmem:[#allocation5 + $0x60] sm:$0xf] }
  0x1f   :  { %v1120_v43 = vld [vmem:[#allocation5 + $0x190] sm:$0xf0]  ;;  %480 = vmatpush.bf16.msra.mxu0 %v1007_v29  ;;  %v995_v46 = vor.u32 %v1324_v40, %v992_v41  ;;  %v1322_v48 = vld [vmem:[#allocation5 + $0x6c] sm:$0xf0]  ;;  %v1102_v49 = vld [vmem:[#allocation5 + $0x160] sm:$0xf] }
  0x20   :  { %493 = vmatpush.bf16.msra.mxu1 %v1135_v33  ;;  %v1123_v50 = vor.u32 %v1356_v42, %v1120_v43  ;;  %v1354_v51 = vld [vmem:[#allocation5 + $0x16c] sm:$0xf0]  ;;  %v1320_v52 = vld [vmem:[#allocation5 + $0x64] sm:$0xf]  ;;  %v976_v53 = vld [vmem:[#allocation5 + $0x70] sm:$0xf0]  ;;  %v975_v56 = vor.u32 %v1322_v48, %v974_v47 }
  0x21   :  { %506 = vmatpush.bf16.msra.mxu2 %v1011_v34  ;;  %v1352_v54 = vld [vmem:[#allocation5 + $0x164] sm:$0xf]  ;;  %v1104_v55 = vld [vmem:[#allocation5 + $0x170] sm:$0xf0]  ;;  %v1103_v57 = vor.u32 %v1354_v51, %v1102_v49  ;;  %v979_v58 = vor.u32 %v1320_v52, %v976_v53  ;;  %v958_v59 = vld [vmem:[#allocation5 + $0x40] sm:$0xf] }
  0x22   :  { %519 = vmatpush.bf16.msra.mxu3 %v1139_v38  ;;  %v1318_v60 = vld [vmem:[#allocation5 + $0x4c] sm:$0xf0]  ;;  %v1086_v61 = vld [vmem:[#allocation5 + $0x140] sm:$0xf]  ;;  %v1107_v62 = vor.u32 %v1352_v54, %v1104_v55  ;;  %v1316_v0 = vld [vmem:[#allocation5 + $0x44] sm:$0xf] }
  0x23   :  { %481 = vmatpush.bf16.msra.mxu0 %v991_v44  ;;  %v1350_v63 = vld [vmem:[#allocation5 + $0x14c] sm:$0xf0]  ;;  %v960_v1 = vld [vmem:[#allocation5 + $0x50] sm:$0xf0]  ;;  %v1348_v2 = vld [vmem:[#allocation5 + $0x144] sm:$0xf]  ;;  %v959_v4 = vor.u32 %v1318_v60, %v958_v59 }
  0x24   :  { %494 = vmatpush.bf16.msra.mxu1 %v1119_v45  ;;  %v1088_v3 = vld [vmem:[#allocation5 + $0x150] sm:$0xf0]  ;;  %v1087_v5 = vor.u32 %v1350_v63, %v1086_v61  ;;  %v963_v6 = vor.u32 %v1316_v0, %v960_v1  ;;  %v942_v7 = vld [vmem:[#allocation5 + $0x20] sm:$0xf]  ;;  %v1314_v8 = vld [vmem:[#allocation5 + $0x2c] sm:$0xf0] }
  0x25   :  { %507 = vmatpush.bf16.msra.mxu2 %v995_v46  ;;  %v1070_v9 = vld [vmem:[#allocation5 + $0x120] sm:$0xf]  ;;  %v1091_v10 = vor.u32 %v1348_v2, %v1088_v3  ;;  %v1346_v11 = vld [vmem:[#allocation5 + $0x12c] sm:$0xf0]  ;;  %v1312_v12 = vld [vmem:[#allocation5 + $0x24] sm:$0xf]  ;;  %v943_v16 = vor.u32 %v1314_v8, %v942_v7 }
  0x26   :  { %520 = vmatpush.bf16.msra.mxu3 %v1123_v50  ;;  %v944_v13 = vld [vmem:[#allocation5 + $0x30] sm:$0xf0]  ;;  %v1344_v14 = vld [vmem:[#allocation5 + $0x124] sm:$0xf]  ;;  %v926_v17 = vld [vmem:[#allocation5] sm:$0xf]  ;;  %v1071_v19 = vor.u32 %v1346_v11, %v1070_v9 }
  0x27   :  { %482 = vmatpush.bf16.msra.mxu0 %v975_v56  ;;  %v1072_v15 = vld [vmem:[#allocation5 + $0x130] sm:$0xf0]  ;;  %v1310_v18 = vld [vmem:[#allocation5 + $0xc] sm:$0xf0]  ;;  %v947_v20 = vor.u32 %v1312_v12, %v944_v13  ;;  %v1054_v21 = vld [vmem:[#allocation5 + $0x100] sm:$0xf] }
  0x28   :  { %495 = vmatpush.bf16.msra.mxu1 %v1103_v57  ;;  %v1342_v22 = vld [vmem:[#allocation5 + $0x10c] sm:$0xf0]  ;;  %v1308_v23 = vld [vmem:[#allocation5 + $0x4] sm:$0xf]  ;;  %v1075_v24 = vor.u32 %v1344_v14, %v1072_v15  ;;  %v928_v25 = vld [vmem:[#allocation5 + $0x10] sm:$0xf0]  ;;  %v927_v31 = vor.u32 %v1310_v18, %v926_v17 }
  0x29   :  { %508 = vmatpush.bf16.msra.mxu2 %v979_v58  ;;  %v1340_v26 = vld [vmem:[#allocation5 + $0x104] sm:$0xf]  ;;  %v1056_v27 = vld [vmem:[#allocation5 + $0x110] sm:$0xf0]  ;;  %v1046_v28 = vld [vmem:[#allocation5 + $0xe8] sm:$0xf]  ;;  %v1055_v35 = vor.u32 %v1342_v22, %v1054_v21  ;;  %v931_v36 = vor.u32 %v1308_v23, %v928_v25 }
  0x2a   :  { %521 = vmatpush.bf16.msra.mxu3 %v1107_v62  ;;  %v1339_v29 = vld [vmem:[#allocation5 + $0xf4] sm:$0xf0]  ;;  %v1174_v30 = vld [vmem:[#allocation5 + $0x1e8] sm:$0xf]  ;;  %v1337_v33 = vld [vmem:[#allocation5 + $0xec] sm:$0xf]  ;;  %v1059_v40 = vor.u32 %v1340_v26, %v1056_v27 }
  0x2b   :  { %483 = vmatpush.bf16.msra.mxu0 %v959_v4  ;;  %v1371_v32 = vld [vmem:[#allocation5 + $0x1f4] sm:$0xf0]  ;;  %v1048_v34 = vld [vmem:[#allocation5 + $0xf8] sm:$0xf0]  ;;  %v1369_v37 = vld [vmem:[#allocation5 + $0x1ec] sm:$0xf]  ;;  %v1047_v41 = vor.u32 %v1339_v29, %v1046_v28 }
  0x2c   :  { %496 = vmatpush.bf16.msra.mxu1 %v1087_v5  ;;  %v1176_v38 = vld [vmem:[#allocation5 + $0x1f8] sm:$0xf0]  ;;  %v80_v39 = vld [vmem:[#allocation2] sm:$0xff]  ;;  %v1175_v43 = vor.u32 %v1371_v32, %v1174_v30  ;;  %v1051_v44 = vor.u32 %v1337_v33, %v1048_v34  ;;  %v1030_v45 = vld [vmem:[#allocation5 + $0xc8] sm:$0xf]  ;;  %s1550_s15 = smov [#allocation10]  }
  0x2d   :  { %509 = vmatpush.bf16.msra.mxu2 %v963_v6  ;;  %v81_v42 = vld [vmem:[#allocation2 + $0x8] sm:$0xff]  ;;  %v1158_v47 = vld [vmem:[#allocation5 + $0x1c8] sm:$0xf]  ;;  %v1179_v48 = vor.u32 %v1369_v37, %v1176_v38  ;;  %v1333_v50 = vld [vmem:[#allocation5 + $0xcc] sm:$0xf]  ;;  %v1593_v52 = vpack.c.bf16 %v80_v39, %v80_v39  ;;  %s910_s16 = sshll.u32 %s1550_s15, 4  ;;  %s911_s16 = int_to_ptr.vmem [resolvable:$true] %s910_s16 }
  0x2e   :  { %522 = vmatpush.bf16.msra.mxu3 %v1091_v10  ;;  %v1335_v46 = vld [vmem:[#allocation5 + $0xd4] sm:$0xf0]  ;;  %v1032_v51 = vld [vmem:[#allocation5 + $0xd8] sm:$0xf0]  ;;  %v1365_v53 = vld [vmem:[#allocation5 + $0x1cc] sm:$0xf]  ;;  %v1595_v55 = vpack.c.bf16 %v81_v42, %v81_v42 }
  0x2f   :  { %484 = vmatpush.bf16.msra.mxu0 %v943_v16  ;;  %v1367_v49 = vld [vmem:[#allocation5 + $0x1d4] sm:$0xf0]  ;;  %v1160_v54 = vld [vmem:[#allocation5 + $0x1d8] sm:$0xf0]  ;;  %v1031_v56 = vor.u32 %v1335_v46, %v1030_v45  ;;  %v1035_v58 = vor.u32 %v1333_v50, %v1032_v51  ;;  %v1014_v59 = vld [vmem:[#allocation5 + $0xa8] sm:$0xf] }
  0x30   :  { %497 = vmatpush.bf16.msra.mxu1 %v1071_v19  ;;  %v1159_v57 = vor.u32 %v1367_v49, %v1158_v47  ;;  %v1331_v60 = vld [vmem:[#allocation5 + $0xb4] sm:$0xf0]  ;;  %v1142_v61 = vld [vmem:[#allocation5 + $0x1a8] sm:$0xf]  ;;  %v1163_v62 = vor.u32 %v1365_v53, %v1160_v54  ;;  %v1329_v0 = vld [vmem:[#allocation5 + $0xac] sm:$0xf] }
  0x31   :  { %510 = vmatpush.bf16.msra.mxu2 %v947_v20  ;;  %v1363_v63 = vld [vmem:[#allocation5 + $0x1b4] sm:$0xf0]  ;;  %v1016_v1 = vld [vmem:[#allocation5 + $0xb8] sm:$0xf0]  ;;  %v1361_v2 = vld [vmem:[#allocation5 + $0x1ac] sm:$0xf]  ;;  %v1015_v4 = vor.u32 %v1331_v60, %v1014_v59 }
  0x32   :  { %523 = vmatpush.bf16.msra.mxu3 %v1075_v24  ;;  %v1144_v3 = vld [vmem:[#allocation5 + $0x1b8] sm:$0xf0]  ;;  %v1143_v5 = vor.u32 %v1363_v63, %v1142_v61  ;;  %v1019_v6 = vor.u32 %v1329_v0, %v1016_v1  ;;  %v998_v7 = vld [vmem:[#allocation5 + $0x88] sm:$0xf]  ;;  %v1327_v8 = vld [vmem:[#allocation5 + $0x94] sm:$0xf0] }
  0x33   :  { %485 = vmatpush.bf16.msra.mxu0 %v927_v31  ;;  %v1126_v9 = vld [vmem:[#allocation5 + $0x188] sm:$0xf]  ;;  %v1147_v10 = vor.u32 %v1361_v2, %v1144_v3  ;;  %v1359_v11 = vld [vmem:[#allocation5 + $0x194] sm:$0xf0]  ;;  %v1325_v12 = vld [vmem:[#allocation5 + $0x8c] sm:$0xf]  ;;  %v999_v16 = vor.u32 %v1327_v8, %v998_v7 }
  0x34   :  { %498 = vmatpush.bf16.msra.mxu1 %v1055_v35  ;;  %v1000_v13 = vld [vmem:[#allocation5 + $0x98] sm:$0xf0]  ;;  %v1357_v14 = vld [vmem:[#allocation5 + $0x18c] sm:$0xf]  ;;  %v1127_v17 = vor.u32 %v1359_v11, %v1126_v9  ;;  %v982_v19 = vld [vmem:[#allocation5 + $0x68] sm:$0xf] }
  0x35   :  { %511 = vmatpush.bf16.msra.mxu2 %v931_v36  ;;  %v1128_v15 = vld [vmem:[#allocation5 + $0x198] sm:$0xf0]  ;;  %v1003_v18 = vor.u32 %v1325_v12, %v1000_v13  ;;  %v1323_v20 = vld [vmem:[#allocation5 + $0x74] sm:$0xf0]  ;;  %v1110_v21 = vld [vmem:[#allocation5 + $0x168] sm:$0xf] }
  0x36   :  { %524 = vmatpush.bf16.msra.mxu3 %v1059_v40  ;;  %486 = vmatmul.bf16.vlgmr.msra.gmra.mxu0 %v1593_v52  ;;  %v1131_v22 = vor.u32 %v1357_v14, %v1128_v15  ;;  %v1355_v23 = vld [vmem:[#allocation5 + $0x174] sm:$0xf0]  ;;  %v1321_v24 = vld [vmem:[#allocation5 + $0x6c] sm:$0xf]  ;;  %v984_v25 = vld [vmem:[#allocation5 + $0x78] sm:$0xf0]  ;;  %v983_v28 = vor.u32 %v1323_v20, %v982_v19 }
  0x37   :  { %530 = vmatpush.bf16.msrb.mxu0 %v1047_v41  ;;  %499 = vmatmul.bf16.vlgmr.msra.gmra.mxu1 %v1595_v55  ;;  %v1353_v26 = vld [vmem:[#allocation5 + $0x16c] sm:$0xf]  ;;  %v1112_v27 = vld [vmem:[#allocation5 + $0x178] sm:$0xf0]  ;;  %v966_v29 = vld [vmem:[#allocation5 + $0x48] sm:$0xf]  ;;  %v1111_v30 = vor.u32 %v1355_v23, %v1110_v21  ;;  %v987_v31 = vor.u32 %v1321_v24, %v984_v25 }
  0x38   :  { %543 = vmatpush.bf16.msrb.mxu1 %v1175_v43  ;;  %512 = vmatmul.bf16.vlgmr.msra.gmra.mxu2 %v1593_v52  ;;  %v1319_v32 = vld [vmem:[#allocation5 + $0x54] sm:$0xf0]  ;;  %v1094_v33 = vld [vmem:[#allocation5 + $0x148] sm:$0xf]  ;;  %v1115_v34 = vor.u32 %v1353_v26, %v1112_v27  ;;  %v1317_v36 = vld [vmem:[#allocation5 + $0x4c] sm:$0xf] }
  0x39   :  { %556 = vmatpush.bf16.msrb.mxu2 %v1051_v44  ;;  %525 = vmatmul.bf16.vlgmr.msra.gmra.mxu3 %v1595_v55  ;;  %v1351_v35 = vld [vmem:[#allocation5 + $0x154] sm:$0xf0]  ;;  %v968_v37 = vld [vmem:[#allocation5 + $0x58] sm:$0xf0]  ;;  %v1349_v38 = vld [vmem:[#allocation5 + $0x14c] sm:$0xf]  ;;  %v967_v40 = vor.u32 %v1319_v32, %v966_v29 }
  0x3a   :  { %569 = vmatpush.bf16.msrb.mxu3 %v1179_v48  ;;  %v1096_v39 = vld [vmem:[#allocation5 + $0x158] sm:$0xf0]  ;;  %v1095_v41 = vor.u32 %v1351_v35, %v1094_v33  ;;  %v971_v42 = vor.u32 %v1317_v36, %v968_v37  ;;  %v950_v43 = vld [vmem:[#allocation5 + $0x28] sm:$0xf]  ;;  %v1315_v44 = vld [vmem:[#allocation5 + $0x34] sm:$0xf0] }
  0x3b   :  { %531 = vmatpush.bf16.msrb.mxu0 %v1031_v56  ;;  %v1078_v45 = vld [vmem:[#allocation5 + $0x128] sm:$0xf]  ;;  %v1099_v46 = vor.u32 %v1349_v38, %v1096_v39  ;;  %v1347_v47 = vld [vmem:[#allocation5 + $0x134] sm:$0xf0]  ;;  %v1313_v48 = vld [vmem:[#allocation5 + $0x2c] sm:$0xf]  ;;  %v951_v53 = vor.u32 %v1315_v44, %v950_v43 }
  0x3c   :  { %544 = vmatpush.bf16.msrb.mxu1 %v1159_v57  ;;  %v952_v49 = vld [vmem:[#allocation5 + $0x38] sm:$0xf0]  ;;  %v1345_v50 = vld [vmem:[#allocation5 + $0x12c] sm:$0xf]  ;;  %v1079_v54 = vor.u32 %v1347_v47, %v1078_v45  ;;  %v934_v57 = vld [vmem:[#allocation5 + $0x8] sm:$0xf] }
  0x3d   :  { %557 = vmatpush.bf16.msrb.mxu2 %v1035_v58  ;;  %v1080_v51 = vld [vmem:[#allocation5 + $0x138] sm:$0xf0]  ;;  %v955_v56 = vor.u32 %v1313_v48, %v952_v49  ;;  %v1311_v58 = vld [vmem:[#allocation5 + $0x14] sm:$0xf0]  ;;  %v1062_v59 = vld [vmem:[#allocation5 + $0x108] sm:$0xf] }
  0x3e   :  { %570 = vmatpush.bf16.msrb.mxu3 %v1163_v62  ;;  %v1083_v60 = vor.u32 %v1345_v50, %v1080_v51  ;;  %v1343_v61 = vld [vmem:[#allocation5 + $0x114] sm:$0xf0]  ;;  %v1309_v62 = vld [vmem:[#allocation5 + $0xc] sm:$0xf]  ;;  %v936_v63 = vld [vmem:[#allocation5 + $0x18] sm:$0xf0]  ;;  %v935_v2 = vor.u32 %v1311_v58, %v934_v57 }
  0x3f   :  { %532 = vmatpush.bf16.msrb.mxu0 %v1015_v4  ;;  %v1341_v0 = vld [vmem:[#allocation5 + $0x10c] sm:$0xf]  ;;  %v1064_v1 = vld [vmem:[#allocation5 + $0x118] sm:$0xf0]  ;;  %v1063_v3 = vor.u32 %v1343_v61, %v1062_v59  ;;  %v939_v4 = vor.u32 %v1309_v62, %v936_v63  ;;  %v1378_v9 = vld [vmem:[#allocation8 + $0x30] sm:$0xff]  ;;  %s912_s19 = sshll.u32 %s1616_s5, 4  ;;  %s913_s19 = int_to_ptr.hbm [resolvable:$true] %s912_s19 }
  0x40   :  { %545 = vmatpush.bf16.msrb.mxu1 %v1143_v5  ;;  %v1067_v5 = vor.u32 %v1341_v0, %v1064_v1  ;;  %v1387_v7 = vld [vmem:[#allocation8 + $0x78] sm:$0xff]  ;;  %v1377_v11 = vld [vmem:[#allocation8 + $0x28] sm:$0xff]  ;;  %v1376_v13 = vld [vmem:[#allocation8 + $0x20] sm:$0xff]  ;;  %vm903_vm0 = vcmask 64512  }
  0x41   :  { %558 = vmatpush.bf16.msrb.mxu2 %v1019_v6  ;;  %v1379_v6 = vld [vmem:[#allocation8 + $0x38] sm:$0xff]  ;;  %v1385_v12 = vld [vmem:[#allocation8 + $0x68] sm:$0xff]  ;;  %v1384_v14 = vld [vmem:[#allocation8 + $0x60] sm:$0xff] }
  0x42   :  { %571 = vmatpush.bf16.msrb.mxu3 %v1147_v10  ;;  %v1395_v8 = vld [vmem:[#allocation8 + $0xb8] sm:$0xff]  ;;  %v1386_v10 = vld [vmem:[#allocation8 + $0x70] sm:$0xff]  ;;  %v1381_v19 = vld [vmem:[#allocation8 + $0x48] sm:$0xff] }
  0x43   :  { %533 = vmatpush.bf16.msrb.mxu0 %v999_v16  ;;  %v1375_v15 = vld [vmem:[#allocation8 + $0x18] sm:$0xff]  ;;  %v1393_v21 = vld [vmem:[#allocation8 + $0xa8] sm:$0xff]  ;;  %v1380_v23 = vld [vmem:[#allocation8 + $0x40] sm:$0xff] }
  0x44   :  { %546 = vmatpush.bf16.msrb.mxu1 %v1127_v17  ;;  %v1383_v16 = vld [vmem:[#allocation8 + $0x58] sm:$0xff]  ;;  %v1374_v17 = vld [vmem:[#allocation8 + $0x10] sm:$0xff]  ;;  %v1392_v25 = vld [vmem:[#allocation8 + $0xa0] sm:$0xff] }
  0x45   :  { %559 = vmatpush.bf16.msrb.mxu2 %v1003_v18  ;;  %v1382_v18 = vld [vmem:[#allocation8 + $0x50] sm:$0xff]  ;;  %v1403_v20 = vld [vmem:[#allocation8 + $0xf8] sm:$0xff]  ;;  %v1401_v26 = vld [vmem:[#allocation8 + $0xe8] sm:$0xff] }
  0x46   :  { %572 = vmatpush.bf16.msrb.mxu3 %v1131_v22  ;;  %v1372_v22 = vld [vmem:[#allocation8] sm:$0xff]  ;;  %v1402_v24 = vld [vmem:[#allocation8 + $0xf0] sm:$0xff]  ;;  %v1391_v27 = vld [vmem:[#allocation8 + $0x98] sm:$0xff] }
  0x47   :  { %534 = vmatpush.bf16.msrb.mxu0 %v983_v28  ;;  %v1400_v28 = vld [vmem:[#allocation8 + $0xe0] sm:$0xff]  ;;  %v1390_v29 = vld [vmem:[#allocation8 + $0x90] sm:$0xff]  ;;  %v1389_v33 = vld [vmem:[#allocation8 + $0x88] sm:$0xff] }
  0x48   :  { %547 = vmatpush.bf16.msrb.mxu1 %v1111_v30  ;;  %v148_v30 = vld [vmem:[#allocation7] sm:$0xf]  ;;  %v1398_v35 = vld [vmem:[#allocation8 + $0xd0] sm:$0xff]  ;;  %v1388_v39 = vld [vmem:[#allocation8 + $0x80] sm:$0xff] }
  0x49   :  { %560 = vmatpush.bf16.msrb.mxu2 %v987_v31  ;;  %v1399_v31 = vld [vmem:[#allocation8 + $0xd8] sm:$0xff]  ;;  %v150_v32 = vperm.slane %v148_v30, 0  ;;  %v151_v38 = vperm.slane %v148_v30, 1  ;;  %v1396_v49 = vld [vmem:[#allocation8 + $0xc0] sm:$0xff]  ;;  %v152_v57 = vperm.slane %v148_v30, 2  ;;  %v153_v62 = vperm.slane %v148_v30, 3 }
  0x4a   :  { %573 = vmatpush.bf16.msrb.mxu3 %v1115_v34 }
  0x4b   :  { %535 = vmatpush.bf16.msrb.mxu0 %v967_v40 }
  0x4c   :  { %548 = vmatpush.bf16.msrb.mxu1 %v1095_v41  ;;  %v1397_v41 = vld [vmem:[#allocation8 + $0xc8] sm:$0xff] }
  0x4d   :  { %561 = vmatpush.bf16.msrb.mxu2 %v971_v42 }
  0x4e   :  { %574 = vmatpush.bf16.msrb.mxu3 %v1099_v46 }
  0x4f   :  { %536 = vmatpush.bf16.msrb.mxu0 %v951_v53 }
  0x50   :  { %549 = vmatpush.bf16.msrb.mxu1 %v1079_v54 }
  0x51   :  { %562 = vmatpush.bf16.msrb.mxu2 %v955_v56 }
  0x52   :  { %575 = vmatpush.bf16.msrb.mxu3 %v1083_v60 }
  0x53   :  { %537 = vmatpush.bf16.msrb.mxu0 %v935_v2 }
  0x54   :  { %550 = vmatpush.bf16.msrb.mxu1 %v1063_v3 }
  0x55   :  { %563 = vmatpush.bf16.msrb.mxu2 %v939_v4 }
  0x56   :  { %576 = vmatpush.bf16.msrb.mxu3 %v1067_v5  ;;  %538 = vmatmul.bf16.vlgmr.msrb.gmra.mxu0 %v1593_v52 }
  0x57   :  { %846 = vmatpush.bf16.msra.mxu0 %v1379_v6  ;;  %551 = vmatmul.bf16.vlgmr.msrb.gmra.mxu1 %v1595_v55 }
  0x58   :  { %859 = vmatpush.bf16.msra.mxu1 %v1387_v7  ;;  %564 = vmatmul.bf16.vlgmr.msrb.gmra.mxu2 %v1593_v52  ;;  %v1394_v52 = vld [vmem:[#allocation8 + $0xb0] sm:$0xff] }
  0x59   :  { %577 = vmatmul.bf16.vlgmr.msrb.gmra.mxu3 %v1595_v55  ;;  %872 = vmatpush.bf16.msra.mxu2 %v1395_v8  ;;  %v1373_v55 = vld [vmem:[#allocation8 + $0x8] sm:$0xff] }
  0x5a   :  { %885 = vmatpush.bf16.msra.mxu3 %v1403_v20 }
  0x5b   :  { %847 = vmatpush.bf16.msra.mxu0 %v1378_v9 }
  0x5c   :  { %860 = vmatpush.bf16.msra.mxu1 %v1386_v10 }
  0x5d   :  { %873 = vmatpush.bf16.msra.mxu2 %v1394_v52 }
  0x5e   :  { %886 = vmatpush.bf16.msra.mxu3 %v1402_v24 }
  0x5f   :  { %848 = vmatpush.bf16.msra.mxu0 %v1377_v11 }
  0x60   :  { %861 = vmatpush.bf16.msra.mxu1 %v1385_v12 }
  0x61   :  { %874 = vmatpush.bf16.msra.mxu2 %v1393_v21 }
  0x62   :  { %887 = vmatpush.bf16.msra.mxu3 %v1401_v26 }
  0x63   :  { %849 = vmatpush.bf16.msra.mxu0 %v1376_v13 }
  0x64   :  { %862 = vmatpush.bf16.msra.mxu1 %v1384_v14 }
  0x65   :  { %875 = vmatpush.bf16.msra.mxu2 %v1392_v25 }
  0x66   :  { %888 = vmatpush.bf16.msra.mxu3 %v1400_v28 }
  0x67   :  { %850 = vmatpush.bf16.msra.mxu0 %v1375_v15 }
  0x68   :  { %863 = vmatpush.bf16.msra.mxu1 %v1383_v16 }
  0x69   :  { %876 = vmatpush.bf16.msra.mxu2 %v1391_v27 }
  0x6a   :  { %889 = vmatpush.bf16.msra.mxu3 %v1399_v31 }
  0x6b   :  { %851 = vmatpush.bf16.msra.mxu0 %v1374_v17 }
  0x6c   :  { %864 = vmatpush.bf16.msra.mxu1 %v1382_v18  ;;  %v1413_v18 = vld [vmem:[%s1615_s4] ss:$0 sm:$0xff] }
  0x6d   :  { %877 = vmatpush.bf16.msra.mxu2 %v1390_v29 }
  0x6e   :  { %890 = vmatpush.bf16.msra.mxu3 %v1398_v35 }
  0x6f   :  { %852 = vmatpush.bf16.msra.mxu0 %v1373_v55 }
  0x70   :  { %865 = vmatpush.bf16.msra.mxu1 %v1381_v19 }
  0x71   :  { %878 = vmatpush.bf16.msra.mxu2 %v1389_v33 }
  0x72   :  { %891 = vmatpush.bf16.msra.mxu3 %v1397_v41 }
  0x73   :  { %853 = vmatpush.bf16.msra.mxu0 %v1372_v22 }
  0x74   :  { %866 = vmatpush.bf16.msra.mxu1 %v1380_v23 }
  0x75   :  { %879 = vmatpush.bf16.msra.mxu2 %v1388_v39 }
  0x76   :  { %892 = vmatpush.bf16.msra.mxu3 %v1396_v49 }
  0xb3   :  { %v487_v34 = vpop.f32.mrf.mxu0 }
  0xb4   :  { %v488_v36 = vadd.f32 %v487_v34, %v150_v32  ;;  %v500_v37 = vpop.f32.mrf.mxu1 }
  0xb6   :  { %v501_v40 = vadd.f32 %v500_v37, %v488_v36 }
  0xb8   :  { %v582_v43 = vmax.f32 %v501_v40, 0.0 }
  0xba   :  { %v586_v46 = vpack.c.bf16 %v582_v43, %v582_v43 }
  0xbb   :  { %v513_v42 = vpop.f32.mrf.mxu2  ;;  %v489_v48 = vpop.f32.mrf.mxu0 }
  0xbc   :  { %v514_v44 = vadd.f32 %v513_v42, %v151_v38  ;;  %v526_v45 = vpop.f32.mrf.mxu3  ;;  %854 = vmatmul.bf16.vlgmr.msra.gmra.mxu0 %v586_v46  ;;  %v502_v50 = vpop.f32.mrf.mxu1 }
  0xbe   :  { %v527_v47 = vadd.f32 %v526_v45, %v514_v44 }
  0xc0   :  { %v583_v51 = vmax.f32 %v527_v47, 0.0 }
  0xc2   :  { %v587_v53 = vpack.c.bf16 %v583_v51, %v583_v51 }
  0xc3   :  { %v515_v54 = vpop.f32.mrf.mxu2 }
  0xc4   :  { %867 = vmatmul.bf16.vlgmr.msra.gmra.mxu1 %v587_v53  ;;  %v528_v56 = vpop.f32.mrf.mxu3 }
  0xd3   :  { %v539_v58 = vpop.f32.mrf.mxu0 }
  0xd4   :  { %v540_v59 = vadd.f32 %v539_v58, %v152_v57  ;;  %v552_v60 = vpop.f32.mrf.mxu1 }
  0xd6   :  { %v553_v61 = vadd.f32 %v552_v60, %v540_v59 }
  0xd8   :  { %v584_v63 = vmax.f32 %v553_v61, 0.0 }
  0xda   :  { %v588_v0 = vpack.c.bf16 %v584_v63, %v584_v63 }
  0xdb   :  { %v565_v1 = vpop.f32.mrf.mxu2  ;;  %v541_v4 = vpop.f32.mrf.mxu0 }
  0xdc   :  { %v566_v2 = vadd.f32 %v565_v1, %v153_v62  ;;  %v578_v3 = vpop.f32.mrf.mxu3  ;;  %v554_v5 = vpop.f32.mrf.mxu1  ;;  %880 = vmatmul.bf16.vlgmr.msra.gmra.mxu2 %v588_v0 }
  0xde   :  { %v579_v6 = vadd.f32 %v578_v3, %v566_v2 }
  0xe0   :  { %v585_v7 = vmax.f32 %v579_v6, 0.0 }
  0xe2   :  { %v589_v8 = vpack.c.bf16 %v585_v7, %v585_v7 }
  0xe3   :  { %v567_v9 = vpop.f32.mrf.mxu2 }
  0xe4   :  { %v580_v10 = vpop.f32.mrf.mxu3  ;;  %893 = vmatmul.bf16.vlgmr.msra.gmra.mxu3 %v589_v8 }
 0x139   :  { %v855_v11 = vpop.f32.mrf.mxu0 }
 0x141   :  { %v868_v12 = vpop.f32.mrf.mxu1  ;;  %v857_v13 = vpop.f32.mrf.mxu0 }
 0x142   :  { %v869_v16 = vadd.f32 %v868_v12, %v855_v11 }
 0x149   :  { %v870_v14 = vpop.f32.mrf.mxu1 }
 0x15f   :  { %v881_v15 = vpop.f32.mrf.mxu2 }
 0x160   :  { %v882_v17 = vadd.f32 %v881_v15, %v869_v16 }
 0x167   :  { %v894_v52 = vpop.f32.mrf.mxu3  ;;  %v883_v19 = vpop.f32.mrf.mxu2 }
 0x168   :  { %v895_v55 = vadd.f32 %v894_v52, %v882_v17 }
 0x16a   :  { %v902_v20 = vadd.f32 %v1413_v18, %v895_v55 }
 0x16c   :  { %904 = vst.msk [vmem:[#allocation10] sm:$0xff] %vm903_vm0, %v902_v20 }
 0x16d   :  { %915 = dma.vmem_to_hbm [thread:$0]  %s911_s16, 128, %s913_s19, [#allocation4]  }
 0x16f   :  { %v896_v21 = vpop.f32.mrf.mxu3 }
 0x170   :  { %1540 = dma.done.wait [#allocation4], 128  }
 0x171   :  { %1541 = vsyncadd [#allocation4], 4294967168 }
 0x172   :  { %920 = vsyncpa [#allocation3], 1 }
 0x173   :  { %921 = vsyncpa [#allocation6], 1 }
 0x174   :  { %922 = vsyncpa [#allocation9], 1 }
 0x175   :  { %923 = vsyncpa [#allocation4], 1 }

</bundles_post_ra>
